<compile_context>
chip_gen: v7x
topology: tpu7x:2x2x1
jax: 0.10.0
libtpu: 0.0.40
codegen_flags: <defaults>
</compile_context>

<pallas_src>
import functools

import jax
import jax.numpy as jnp
from jax.experimental import pallas as pl
from jax.experimental.pallas import tpu as pltpu

LANE = 128       # vreg lane width
ROW_ALIGN = 16   # bf16 packs 2 rows/sublane -> 16-row tile granularity
HIDDEN = 50
HIDDEN_P = 128   # hidden dim padded to full lanes


def _round_up(x, m):
    return (x + m - 1) // m * m


def mlp_kernel(x_ref, w1_ref, b1_ref, w2_ref, b2_ref,
               w3_ref, b3_ref, w4_ref, b4_ref, o_ref):
    # fc1 + relu  (cast the f32 input tile to bf16 in-kernel; f32 accumulate)
    x = x_ref[...].astype(jnp.bfloat16)
    h = jnp.dot(x, w1_ref[...], preferred_element_type=jnp.float32)
    h = jnp.maximum(h + b1_ref[...], 0.0)
    # fc2 + relu
    h = jnp.dot(h.astype(jnp.bfloat16), w2_ref[...],
                preferred_element_type=jnp.float32)
    h = jnp.maximum(h + b2_ref[...], 0.0)
    # dropout(p=0.0) is the identity -> no-op
    # fc3 + relu
    h = jnp.dot(h.astype(jnp.bfloat16), w3_ref[...],
                preferred_element_type=jnp.float32)
    h = jnp.maximum(h + b3_ref[...], 0.0)
    # fc4 + tanh * 10   (unpadded out_dim columns -> lean writeback)
    out = jnp.dot(h.astype(jnp.bfloat16), w4_ref[...],
                  preferred_element_type=jnp.float32)
    o_ref[...] = (jnp.tanh(out + b4_ref[...]) * 10.0).astype(o_ref.dtype)


def pad_params(params):
    """Zero-pad the hidden dim to 128 lanes; weights -> bf16, biases -> f32.

    Input dim and output dim are left UNPADDED (their blocks equal the full
    array dims, which satisfies the layout rules). Done once, off the hot path.
    """
    (w1, b1, w2, b2, w3, b3, w4, b4) = params
    in_dim = w1.shape[0]
    out_dim = w4.shape[1]

    def pad_w(w, rp, cp):
        r, c = w.shape
        return jnp.pad(w, ((0, rp - r), (0, cp - c))).astype(jnp.bfloat16)

    def pad_b(b, cp):
        return jnp.pad(b, ((0, 0), (0, cp - b.shape[1]))).astype(jnp.float32)

    return (pad_w(w1, in_dim, HIDDEN_P), pad_b(b1, HIDDEN_P),
            pad_w(w2, HIDDEN_P, HIDDEN_P), pad_b(b2, HIDDEN_P),
            pad_w(w3, HIDDEN_P, HIDDEN_P), pad_b(b3, HIDDEN_P),
            pad_w(w4, HIDDEN_P, out_dim), pad_b(b4, out_dim))


@functools.partial(jax.jit, static_argnames=("tb_max",))
def dcmodel_forward(x, padded_params, *, tb_max=4096):
    (w1, b1, w2, b2, w3, b3, w4, b4) = padded_params
    B, in_dim = x.shape
    out_dim = w4.shape[1]

    # Batch tile: aim for >= 4 grid steps when B allows (shards across both
    # v7x TensorCores and overlaps DMA with compute), 16-row granularity,
    # capped at tb_max rows for DMA efficiency on huge batches.
    tb = max(ROW_ALIGN, min(tb_max, _round_up(pl.cdiv(B, 4), ROW_ALIGN)))
    grid = (pl.cdiv(B, tb),)  # ragged last tile; no wrapper-side batch padding

    def resident(arr):  # weights/biases: constant block index -> VMEM-resident
        return pl.BlockSpec(arr.shape, lambda i: (0, 0))

    return pl.pallas_call(
        mlp_kernel,
        out_shape=jax.ShapeDtypeStruct((B, out_dim), jnp.float32),
        grid=grid,
        in_specs=[
            pl.BlockSpec((tb, in_dim), lambda i: (i, 0)),  # x: tiled over batch
            resident(w1), resident(b1),
            resident(w2), resident(b2),
            resident(w3), resident(b3),
            resident(w4), resident(b4),
        ],
        out_specs=pl.BlockSpec((tb, out_dim), lambda i: (i, 0)),
        compiler_params=pltpu.CompilerParams(
            dimension_semantics=("parallel",),   # shard batch tiles across TCs
        ),
    )(x, w1, b1, w2, b2, w3, b3, w4, b4)


def init_params(key, input_shape, output_shape, init_w=0.003):
    """Deterministic init mirroring DCModel.init_weights (weights stored as (in, out))."""
    ks = jax.random.split(key, 8)

    def uni(k, shape, bound):
        return jax.random.uniform(k, shape, jnp.float32, -bound, bound)

    w1 = uni(ks[0], (input_shape, 50), 1.0 / jnp.sqrt(float(input_shape)))
    b1 = uni(ks[1], (1, 50), 1.0 / jnp.sqrt(float(input_shape)))
    w2 = uni(ks[2], (50, 50), 1.0 / jnp.sqrt(50.0))
    b2 = uni(ks[3], (1, 50), 1.0 / jnp.sqrt(50.0))
    w3 = uni(ks[4], (50, 50), 1.0 / jnp.sqrt(50.0))
    b3 = uni(ks[5], (1, 50), 1.0 / jnp.sqrt(50.0))
    w4 = uni(ks[6], (50, output_shape), init_w)
    b4 = uni(ks[7], (1, output_shape), 1.0 / jnp.sqrt(50.0))
    return (w1, b1, w2, b2, w3, b3, w4, b4)


def reference_forward(x, params):
    (w1, b1, w2, b2, w3, b3, w4, b4) = params
    h = jnp.maximum(x @ w1 + b1, 0.0)
    h = jnp.maximum(h @ w2 + b2, 0.0)
    h = jnp.maximum(h @ w3 + b3, 0.0)
    return jnp.tanh(h @ w4 + b4) * 10.0


if __name__ == "__main__":
    key = jax.random.PRNGKey(0)
    k_param, k_x, k_x2 = jax.random.split(key, 3)

    input_shape, output_shape = 32, 8
    params = init_params(k_param, input_shape, output_shape, init_w=0.003)
    padded_params = pad_params(params)

    # Tiny batch (launch-overhead regime; single 16-row ragged tile).
    x = jax.random.normal(k_x, (2, input_shape), jnp.float32)
    out = dcmodel_forward(x, padded_params)
    jax.block_until_ready(out)
    ref = reference_forward(x, params)
    assert out.shape == (2, output_shape)
    assert jnp.allclose(out, ref, atol=5e-2, rtol=5e-2), \
        float(jnp.max(jnp.abs(out - ref)))

    # Multi-tile batch exercising the parallel grid axis with a ragged last
    # tile (tb=80 -> tiles of 80/80/80/60 rows, no batch padding).
    x2 = jax.random.normal(k_x2, (300, input_shape), jnp.float32)
    out2 = dcmodel_forward(x2, padded_params)
    jax.block_until_ready(out2)
    ref2 = reference_forward(x2, params)
    assert out2.shape == (300, output_shape)
    assert jnp.allclose(out2, ref2, atol=5e-2, rtol=5e-2), \
        float(jnp.max(jnp.abs(out2 - ref2)))

    print("KERNEL_OK")
</pallas_src>

<mosaic_0001>
module attributes {stable_mosaic.version = 11 : i64} {
  func.func @mlp_kernel(%arg0: i32, %arg1: memref<16x32xf32, #tpu.memory_space<vmem>>, %arg2: memref<32x128xbf16, #tpu.memory_space<vmem>>, %arg3: memref<1x128xf32, #tpu.memory_space<vmem>>, %arg4: memref<128x128xbf16, #tpu.memory_space<vmem>>, %arg5: memref<1x128xf32, #tpu.memory_space<vmem>>, %arg6: memref<128x128xbf16, #tpu.memory_space<vmem>>, %arg7: memref<1x128xf32, #tpu.memory_space<vmem>>, %arg8: memref<128x8xbf16, #tpu.memory_space<vmem>>, %arg9: memref<1x8xf32, #tpu.memory_space<vmem>>, %arg10: memref<16x8xf32, #tpu.memory_space<vmem>>) attributes {dimension_semantics = [#tpu.dimension_semantics<parallel>], iteration_bounds = array<i64: 1>, scalar_prefetch = 0 : i64, scratch_operands = 0 : i64, tpu.core_type = #tpu.core_type<tc>, window_params = [{transform_indices = @transform_0, window_bounds = array<i64: 16, 32>}, {pipeline_mode = #tpu.pipeline_mode<synchronous>, transform_indices = @transform_1, window_bounds = array<i64: 32, 128>}, {pipeline_mode = #tpu.pipeline_mode<synchronous>, transform_indices = @transform_2, window_bounds = array<i64: 1, 128>}, {pipeline_mode = #tpu.pipeline_mode<synchronous>, transform_indices = @transform_3, window_bounds = array<i64: 128, 128>}, {pipeline_mode = #tpu.pipeline_mode<synchronous>, transform_indices = @transform_4, window_bounds = array<i64: 1, 128>}, {pipeline_mode = #tpu.pipeline_mode<synchronous>, transform_indices = @transform_5, window_bounds = array<i64: 128, 128>}, {pipeline_mode = #tpu.pipeline_mode<synchronous>, transform_indices = @transform_6, window_bounds = array<i64: 1, 128>}, {pipeline_mode = #tpu.pipeline_mode<synchronous>, transform_indices = @transform_7, window_bounds = array<i64: 128, 8>}, {pipeline_mode = #tpu.pipeline_mode<synchronous>, transform_indices = @transform_8, window_bounds = array<i64: 1, 8>}, {transform_indices = @transform_9, window_bounds = array<i64: 16, 8>}]} {
    %c0 = arith.constant 0 : index
    %c0_0 = arith.constant 0 : index
    %0 = vector.load %arg1[%c0, %c0_0] : memref<16x32xf32, #tpu.memory_space<vmem>>, vector<16x32xf32>
    %1 = arith.truncf %0 : vector<16x32xf32> to vector<16x32xbf16>
    %c0_1 = arith.constant 0 : index
    %c0_2 = arith.constant 0 : index
    %2 = vector.load %arg2[%c0_1, %c0_2] : memref<32x128xbf16, #tpu.memory_space<vmem>>, vector<32x128xbf16>
    %cst = arith.constant dense<0.000000e+00> : vector<16x128xf32>
    %3 = tpu.matmul %1, %2, %cst {dimension_numbers = #tpu.dot_dimension_numbers<[1], [0], [0], [1], [0, 0, 1, 1], [], []>} : vector<16x32xbf16>, vector<32x128xbf16>, vector<16x128xf32> -> vector<16x128xf32>
    %c0_3 = arith.constant 0 : index
    %c0_4 = arith.constant 0 : index
    %4 = vector.load %arg3[%c0_3, %c0_4] : memref<1x128xf32, #tpu.memory_space<vmem>>, vector<1x128xf32>
    %5 = vector.broadcast %4 : vector<1x128xf32> to vector<16x128xf32>
    %6 = arith.addf %3, %5 : vector<16x128xf32>
    %cst_5 = arith.constant 0.000000e+00 : f32
    %7 = vector.broadcast %cst_5 : f32 to vector<16x128xf32>
    %8 = arith.maximumf %6, %7 : vector<16x128xf32>
    %9 = arith.truncf %8 : vector<16x128xf32> to vector<16x128xbf16>
    %c0_6 = arith.constant 0 : index
    %c0_7 = arith.constant 0 : index
    %10 = vector.load %arg4[%c0_6, %c0_7] : memref<128x128xbf16, #tpu.memory_space<vmem>>, vector<128x128xbf16>
    %cst_8 = arith.constant dense<0.000000e+00> : vector<16x128xf32>
    %11 = tpu.matmul %9, %10, %cst_8 {dimension_numbers = #tpu.dot_dimension_numbers<[1], [0], [0], [1], [0, 0, 1, 1], [], []>} : vector<16x128xbf16>, vector<128x128xbf16>, vector<16x128xf32> -> vector<16x128xf32>
    %c0_9 = arith.constant 0 : index
    %c0_10 = arith.constant 0 : index
    %12 = vector.load %arg5[%c0_9, %c0_10] : memref<1x128xf32, #tpu.memory_space<vmem>>, vector<1x128xf32>
    %13 = vector.broadcast %12 : vector<1x128xf32> to vector<16x128xf32>
    %14 = arith.addf %11, %13 : vector<16x128xf32>
    %cst_11 = arith.constant 0.000000e+00 : f32
    %15 = vector.broadcast %cst_11 : f32 to vector<16x128xf32>
    %16 = arith.maximumf %14, %15 : vector<16x128xf32>
    %17 = arith.truncf %16 : vector<16x128xf32> to vector<16x128xbf16>
    %c0_12 = arith.constant 0 : index
    %c0_13 = arith.constant 0 : index
    %18 = vector.load %arg6[%c0_12, %c0_13] : memref<128x128xbf16, #tpu.memory_space<vmem>>, vector<128x128xbf16>
    %cst_14 = arith.constant dense<0.000000e+00> : vector<16x128xf32>
    %19 = tpu.matmul %17, %18, %cst_14 {dimension_numbers = #tpu.dot_dimension_numbers<[1], [0], [0], [1], [0, 0, 1, 1], [], []>} : vector<16x128xbf16>, vector<128x128xbf16>, vector<16x128xf32> -> vector<16x128xf32>
    %c0_15 = arith.constant 0 : index
    %c0_16 = arith.constant 0 : index
    %20 = vector.load %arg7[%c0_15, %c0_16] : memref<1x128xf32, #tpu.memory_space<vmem>>, vector<1x128xf32>
    %21 = vector.broadcast %20 : vector<1x128xf32> to vector<16x128xf32>
    %22 = arith.addf %19, %21 : vector<16x128xf32>
    %cst_17 = arith.constant 0.000000e+00 : f32
    %23 = vector.broadcast %cst_17 : f32 to vector<16x128xf32>
    %24 = arith.maximumf %22, %23 : vector<16x128xf32>
    %25 = arith.truncf %24 : vector<16x128xf32> to vector<16x128xbf16>
    %c0_18 = arith.constant 0 : index
    %c0_19 = arith.constant 0 : index
    %26 = vector.load %arg8[%c0_18, %c0_19] : memref<128x8xbf16, #tpu.memory_space<vmem>>, vector<128x8xbf16>
    %cst_20 = arith.constant dense<0.000000e+00> : vector<16x8xf32>
    %27 = tpu.matmul %25, %26, %cst_20 {dimension_numbers = #tpu.dot_dimension_numbers<[1], [0], [0], [1], [0, 0, 1, 1], [], []>} : vector<16x128xbf16>, vector<128x8xbf16>, vector<16x8xf32> -> vector<16x8xf32>
    %c0_21 = arith.constant 0 : index
    %c0_22 = arith.constant 0 : index
    %28 = vector.load %arg9[%c0_21, %c0_22] : memref<1x8xf32, #tpu.memory_space<vmem>>, vector<1x8xf32>
    %29 = vector.broadcast %28 : vector<1x8xf32> to vector<16x8xf32>
    %30 = arith.addf %27, %29 : vector<16x8xf32>
    %31 = math.tanh %30 : vector<16x8xf32>
    %cst_23 = arith.constant 1.000000e+01 : f32
    %32 = vector.broadcast %cst_23 : f32 to vector<16x8xf32>
    %33 = arith.mulf %31, %32 : vector<16x8xf32>
    %c0_24 = arith.constant 0 : index
    %c0_25 = arith.constant 0 : index
    %34 = vector.load %arg10[%c0_24, %c0_25] : memref<16x8xf32, #tpu.memory_space<vmem>>, vector<16x8xf32>
    tpu.vector_store %arg10[%c0_24, %c0_25], %33 {strides = array<i32>} : memref<16x8xf32, #tpu.memory_space<vmem>>, vector<16x8xf32>,
    return
  }
  func.func @transform_0(%arg0: i32) -> (i32, i32) {
    %c0_i32 = arith.constant 0 : i32
    %c0_i32_0 = arith.constant 0 : i32
    return %arg0, %c0_i32 : i32, i32
  }
  func.func @transform_1(%arg0: i32) -> (i32, i32) {
    %c0_i32 = arith.constant 0 : i32
    %c0_i32_0 = arith.constant 0 : i32
    %c0_i32_1 = arith.constant 0 : i32
    return %c0_i32, %c0_i32_0 : i32, i32
  }
  func.func @transform_2(%arg0: i32) -> (i32, i32) {
    %c0_i32 = arith.constant 0 : i32
    %c0_i32_0 = arith.constant 0 : i32
    %c0_i32_1 = arith.constant 0 : i32
    return %c0_i32, %c0_i32_0 : i32, i32
  }
  func.func @transform_3(%arg0: i32) -> (i32, i32) {
    %c0_i32 = arith.constant 0 : i32
    %c0_i32_0 = arith.constant 0 : i32
    %c0_i32_1 = arith.constant 0 : i32
    return %c0_i32, %c0_i32_0 : i32, i32
  }
  func.func @transform_4(%arg0: i32) -> (i32, i32) {
    %c0_i32 = arith.constant 0 : i32
    %c0_i32_0 = arith.constant 0 : i32
    %c0_i32_1 = arith.constant 0 : i32
    return %c0_i32, %c0_i32_0 : i32, i32
  }
  func.func @transform_5(%arg0: i32) -> (i32, i32) {
    %c0_i32 = arith.constant 0 : i32
    %c0_i32_0 = arith.constant 0 : i32
    %c0_i32_1 = arith.constant 0 : i32
    return %c0_i32, %c0_i32_0 : i32, i32
  }
  func.func @transform_6(%arg0: i32) -> (i32, i32) {
    %c0_i32 = arith.constant 0 : i32
    %c0_i32_0 = arith.constant 0 : i32
    %c0_i32_1 = arith.constant 0 : i32
    return %c0_i32, %c0_i32_0 : i32, i32
  }
  func.func @transform_7(%arg0: i32) -> (i32, i32) {
    %c0_i32 = arith.constant 0 : i32
    %c0_i32_0 = arith.constant 0 : i32
    %c0_i32_1 = arith.constant 0 : i32
    return %c0_i32, %c0_i32_0 : i32, i32
  }
  func.func @transform_8(%arg0: i32) -> (i32, i32) {
    %c0_i32 = arith.constant 0 : i32
    %c0_i32_0 = arith.constant 0 : i32
    %c0_i32_1 = arith.constant 0 : i32
    return %c0_i32, %c0_i32_0 : i32, i32
  }
  func.func @transform_9(%arg0: i32) -> (i32, i32) {
    %c0_i32 = arith.constant 0 : i32
    %c0_i32_0 = arith.constant 0 : i32
    return %arg0, %c0_i32 : i32, i32
  }
}

</mosaic_0001>

<bundles_post_ra>
// kernel: dcmodel_forward.1
= control target key start
LH: loop header
LB: loop body
LE: loop exit
PB: predicated region body
PF: predicated region fallthrough
CT: control target
= control target key end

     0   :  { %14 = vsyncpa [#allocation3], 0  ;;  %s938_s0 = inlined_call_operand.vmem [shape: f32[2,32], index: 0, kind: input, shape index: {}]   ;;  %s939_s1 = inlined_call_operand.hbm [shape: bf16[32,128], index: 1, kind: input, shape index: {}]   ;;  %s940_s2 = inlined_call_operand.vmem [shape: f32[1,128], index: 2, kind: input, shape index: {}]   ;;  %s941_s3 = inlined_call_operand.vmem [shape: bf16[128,128], index: 3, kind: input, shape index: {}]   ;;  %s942_s4 = inlined_call_operand.vmem [shape: f32[1,128], index: 4, kind: input, shape index: {}]   ;;  %s943_s5 = inlined_call_operand.hbm [shape: bf16[128,128], index: 5, kind: input, shape index: {}]   ;;  %s944_s6 = inlined_call_operand.vmem [shape: f32[1,128], index: 6, kind: input, shape index: {}]   ;;  %s945_s7 = inlined_call_operand.vmem [shape: bf16[128,8], index: 7, kind: input, shape index: {}]   ;;  %s946_s8 = inlined_call_operand.vmem [shape: f32[1,8], index: 8, kind: input, shape index: {}]   ;;  %s947_s9 = inlined_call_operand.hbm [shape: f32[2,8], index: 9, kind: output, shape index: {}]  }
   0x1   :  { %15 = vsyncpa [#allocation6], 0 }
   0x2   :  { %16 = vsyncpa [#allocation4], 0  ;;  %s743_s30 = smov [#allocation2]   ;;  %s671_s13 = scalar_lea.hbm %s939_s1, 256 }
   0x3   :  { %s24_s10 = sshll.u32 %s743_s30, 4  ;;  %p672_p0 = scmp.ne.s32.totalorder %s939_s1, %s671_s13  ;;  %s25_s10 = int_to_ptr.vmem [resolvable:$true] %s24_s10 }
   0x4   :  { %p675_p1 = scmp.lt.u32.totalorder %s671_s13, %s939_s1 }
   0x6   :  { %p677_p2 = pnand %p675_p1, %p672_p0 }
   0x8   :  { %680 = shalt.err (!%p677_p2)
}
   0x9   :  { %s681_s18 = scalar_lea.vmem %s25_s10, 256  ;;  %p686_p4 = scmp.lt.s32.totalorder %s25_s10, %s25_s10 }
   0xa   :  { %p682_p3 = scmp.ne.s32.totalorder %s25_s10, %s681_s18  ;;  %p687_p5 = scmp.lt.s32.totalorder %s681_s18, %s681_s18 }
   0xc   :  { %p688_p6 = por %p687_p5, %p686_p4 }
   0xe   :  { %p689_p7 = pnand %p688_p6, %p682_p3 }
  0x10   :  { %692 = shalt.err (!%p689_p7)
}
  0x11   :  { %s744_s19 = smov 64   ;;  %s745_s20 = smov 4  }
  0x12   :  { %30 = dma.hbm_to_vmem [thread:$0]  %s939_s1, 256, %s25_s10, [#allocation3], %s744_s19, %s744_s19, %s745_s20  }
  0x13   :  { %s746_s23 = smov [#allocation5]   ;;  %s693_s27 = scalar_lea.hbm %s943_s5, 1024 }
  0x14   :  { %s42_s24 = sshll.u32 %s746_s23, 4  ;;  %p694_p8 = scmp.ne.s32.totalorder %s943_s5, %s693_s27  ;;  %s43_s24 = int_to_ptr.vmem [resolvable:$true] %s42_s24 }
  0x15   :  { %p697_p9 = scmp.lt.u32.totalorder %s693_s27, %s943_s5 }
  0x17   :  { %p699_p10 = pnand %p697_p9, %p694_p8 }
  0x19   :  { %702 = shalt.err (!%p699_p10)
}
  0x1a   :  { %s703_s12 = scalar_lea.vmem %s43_s24, 1024  ;;  %p708_p12 = scmp.lt.s32.totalorder %s43_s24, %s43_s24 }
  0x1b   :  { %p704_p11 = scmp.ne.s32.totalorder %s43_s24, %s703_s12  ;;  %p709_p13 = scmp.lt.s32.totalorder %s703_s12, %s703_s12 }
  0x1d   :  { %p710_p0 = por %p709_p13, %p708_p12 }
  0x1f   :  { %p711_p1 = pnand %p710_p0, %p704_p11 }
  0x21   :  { %714 = shalt.err (!%p711_p1)
}
  0x22   :  { %48 = dma.hbm_to_vmem [thread:$0]  %s943_s5, 1024, %s43_s24, [#allocation6], %s744_s19, %s744_s19, %s745_s20  }
  0x23   :  { %737 = dma.done.wait [#allocation3], 256  }
  0x24   :  { %738 = vsyncadd [#allocation3], 4294967040 }
  0x25   :  { %739 = dma.done.wait [#allocation6], 1024  }
  0x26   :  { %740 = vsyncadd [#allocation6], 4294966272  ;;  %v747_v0 = vmov 0.0   ;;  %vm748_vm0 = vmmov 0   ;;  %v641_v1 = vld [vmem:[#allocation2] sm:$0xff]   ;;  %v642_v2 = vld [vmem:[#allocation2 + $0x8] sm:$0xff]  }
  0x27   :  { %564 = vmatprep.subr.bf16.mxu0 %v747_v0  ;;  %568 = vmatprep.mubr.msk.bf16.mxu0 %vm748_vm0, %v747_v0  ;;  %v62_v3 = vld [vmem:[%s938_s0] sm:$0xff]  ;;  %v63_v4 = vld [vmem:[%s938_s0 + $0x8] sm:$0xff]  ;;  %vm88_vm1 = vcmask 261120   ;;  %v645_v8 = vld [vmem:[%s941_s3 + $0x10] sm:$0xff]   ;;  %vm482_vm2 = vcmask 64512  }
  0x28   :  { %572 = vmatprep.subr.bf16.mxu1 %v747_v0  ;;  %588 = vmatprep.mubr.msk.bf16.mxu1 %vm748_vm0, %v747_v0  ;;  %v643_v5 = vld [vmem:[%s941_s3] sm:$0xff]   ;;  %v64_v6 = vpack.c.bf16 %v63_v4, %v62_v3  ;;  %v644_v7 = vld [vmem:[%s941_s3 + $0x8] sm:$0xff]   ;;  %v646_v9 = vld [vmem:[%s941_s3 + $0x18] sm:$0xff]  }
  0x29   :  { %565 = vmatpush3.bf16.msra.mxu0 %v641_v1  ;;  %573 = vmatpush3.bf16.msra.mxu1 %v643_v5  ;;  %v647_v10 = vld [vmem:[%s941_s3 + $0x20] sm:$0xff]   ;;  %v648_v11 = vld [vmem:[%s941_s3 + $0x28] sm:$0xff]   ;;  %v649_v12 = vld [vmem:[%s941_s3 + $0x30] sm:$0xff]  }
  0x2a   :  { %566 = vmatprep.subr.bf16.mxu0 %v747_v0  ;;  %574 = vmatprep.subr.bf16.mxu1 %v747_v0  ;;  %v650_v13 = vld [vmem:[%s941_s3 + $0x38] sm:$0xff]   ;;  %v651_v14 = vld [vmem:[#allocation5] sm:$0xff]   ;;  %v653_v16 = vld [vmem:[#allocation5 + $0x10] sm:$0xff]  }
  0x2b   :  { %v652_v15 = vld [vmem:[#allocation5 + $0x8] sm:$0xff]   ;;  %v654_v17 = vld [vmem:[#allocation5 + $0x18] sm:$0xff]   ;;  %v655_v18 = vld [vmem:[#allocation5 + $0x20] sm:$0xff]  }
  0x2c   :  { %v656_v19 = vld [vmem:[#allocation5 + $0x28] sm:$0xff]   ;;  %v503_v20 = vld [vmem:[%s940_s2] ss:$0 sm:$0xff]  ;;  %v658_v31 = vld [vmem:[#allocation5 + $0x38] sm:$0xff]  }
  0x2d   :  { %567 = vmatpush3.bf16.msra.mxu0 %v642_v2  ;;  %575 = vmatpush3.bf16.msra.mxu1 %v644_v7  ;;  %v657_v30 = vld [vmem:[#allocation5 + $0x30] sm:$0xff]   ;;  %v660_v33 = vld [vmem:[%s945_s7 + $0x8] sm:$0xff]   ;;  %v661_v34 = vld [vmem:[%s945_s7 + $0x10] sm:$0xff]  }
  0x2e   :  { %592 = vmatprep.subr.bf16.mxu0 %v747_v0  ;;  %576 = vmatprep.subr.bf16.mxu1 %v747_v0  ;;  %v659_v32 = vld [vmem:[%s945_s7] sm:$0xff]   ;;  %v662_v35 = vld [vmem:[%s945_s7 + $0x18] sm:$0xff]   ;;  %v664_v37 = vld [vmem:[%s945_s7 + $0x28] sm:$0xff]  }
  0x2f   :  { %v663_v36 = vld [vmem:[%s945_s7 + $0x20] sm:$0xff]   ;;  %v665_v48 = vld [vmem:[%s945_s7 + $0x30] sm:$0xff]   ;;  %v666_v49 = vld [vmem:[%s945_s7 + $0x38] sm:$0xff]  }
  0x30   :  { %569 = vmatmul.mubr.msk.bf16.vlgmr.msra.gmra.mrb[0].mxu0 %vm88_vm1, %v64_v6  ;;  %v507_v38 = vld [vmem:[%s942_s4] ss:$0 sm:$0xff] }
  0x31   :  { %608 = vmatprep.mubr.msk.bf16.mxu0 %vm748_vm0, %v747_v0  ;;  %577 = vmatpush3.bf16.msra.mxu1 %v645_v8  ;;  %v516_v50 = vld [vmem:[%s944_s6] ss:$0 sm:$0xff] }
  0x32   :  { %578 = vmatprep.subr.bf16.mxu1 %v747_v0  ;;  %593 = vmatpush3.bf16.msra.mxu0 %v651_v14  ;;  %v525_v60 = vld [vmem:[%s946_s8] ss:$0 sm:$0xff] }
  0x33   :  { %594 = vmatprep.subr.bf16.mxu0 %v747_v0 }
  0x35   :  { %579 = vmatpush3.bf16.msra.mxu1 %v646_v9 }
  0x36   :  { %580 = vmatprep.subr.bf16.mxu1 %v747_v0  ;;  %595 = vmatpush3.bf16.msra.mxu0 %v652_v15 }
  0x37   :  { %596 = vmatprep.subr.bf16.mxu0 %v747_v0 }
  0x39   :  { %581 = vmatpush3.bf16.msra.mxu1 %v647_v10 }
  0x3a   :  { %582 = vmatprep.subr.bf16.mxu1 %v747_v0  ;;  %597 = vmatpush3.bf16.msra.mxu0 %v653_v16 }
  0x3b   :  { %598 = vmatprep.subr.bf16.mxu0 %v747_v0 }
  0x3d   :  { %583 = vmatpush3.bf16.msra.mxu1 %v648_v11 }
  0x3e   :  { %584 = vmatprep.subr.bf16.mxu1 %v747_v0  ;;  %599 = vmatpush3.bf16.msra.mxu0 %v654_v17 }
  0x3f   :  { %600 = vmatprep.subr.bf16.mxu0 %v747_v0 }
  0x41   :  { %585 = vmatpush3.bf16.msra.mxu1 %v649_v12 }
  0x42   :  { %586 = vmatprep.subr.bf16.mxu1 %v747_v0  ;;  %601 = vmatpush3.bf16.msra.mxu0 %v655_v18 }
  0x43   :  { %602 = vmatprep.subr.bf16.mxu0 %v747_v0 }
  0x45   :  { %587 = vmatpush3.bf16.msra.mxu1 %v650_v13 }
  0x46   :  { %612 = vmatprep.subr.bf16.mxu1 %v747_v0  ;;  %603 = vmatpush3.bf16.msra.mxu0 %v656_v19 }
  0x47   :  { %604 = vmatprep.subr.bf16.mxu0 %v747_v0 }
  0x4a   :  { %605 = vmatpush3.bf16.msra.mxu0 %v657_v30 }
  0x4b   :  { %606 = vmatprep.subr.bf16.mxu0 %v747_v0 }
  0x4e   :  { %607 = vmatpush3.bf16.msra.mxu0 %v658_v31 }
 0x103   :  { %v126_v21 = vpop.f32.mrb[0].mxu0 }
 0x104   :  { %v127_v22 = vadd.f32 %v503_v20, %v126_v21  ;;  %v570_v23 = vpop.f32.mrb[1].mxu0 }
 0x105   :  { %v129_v24 = vpop.f32.mrb[2].mxu0 }
 0x106   :  { %v130_v25 = vadd.f32 %v503_v20, %v129_v24  ;;  %v571_v26 = vpop.f32.mrb[3].mxu0  ;;  %v133_v27 = vmax.f32 %v127_v22, 0.0 }
 0x108   :  { %v134_v28 = vmax.f32 %v130_v25, 0.0 }
 0x10a   :  { %v135_v29 = vpack.c.bf16 %v134_v28, %v133_v27 }
 0x10c   :  { %589 = vmatmul.mubr.bf16.vlgmr.msra.gmra.mrb[0].mxu1 %v135_v29 }
 0x10d   :  { %628 = vmatprep.mubr.msk.bf16.mxu1 %vm748_vm0, %v747_v0  ;;  %613 = vmatpush3.bf16.msra.mxu1 %v659_v32 }
 0x10e   :  { %614 = vmatprep.subr.bf16.mxu1 %v747_v0 }
 0x111   :  { %615 = vmatpush3.bf16.msra.mxu1 %v660_v33 }
 0x112   :  { %616 = vmatprep.subr.bf16.mxu1 %v747_v0 }
 0x115   :  { %617 = vmatpush3.bf16.msra.mxu1 %v661_v34 }
 0x116   :  { %618 = vmatprep.subr.bf16.mxu1 %v747_v0 }
 0x119   :  { %619 = vmatpush3.bf16.msra.mxu1 %v662_v35 }
 0x11a   :  { %620 = vmatprep.subr.bf16.mxu1 %v747_v0 }
 0x11d   :  { %621 = vmatpush3.bf16.msra.mxu1 %v663_v36 }
 0x11e   :  { %622 = vmatprep.subr.bf16.mxu1 %v747_v0 }
 0x121   :  { %623 = vmatpush3.bf16.msra.mxu1 %v664_v37 }
 0x122   :  { %624 = vmatprep.subr.bf16.mxu1 %v747_v0 }
 0x125   :  { %625 = vmatpush3.bf16.msra.mxu1 %v665_v48 }
 0x126   :  { %626 = vmatprep.subr.bf16.mxu1 %v747_v0 }
 0x129   :  { %627 = vmatpush3.bf16.msra.mxu1 %v666_v49 }
 0x1df   :  { %v241_v39 = vpop.f32.mrb[0].mxu1 }
 0x1e0   :  { %v242_v40 = vadd.f32 %v507_v38, %v241_v39  ;;  %v590_v41 = vpop.f32.mrb[1].mxu1 }
 0x1e1   :  { %v244_v42 = vpop.f32.mrb[2].mxu1 }
 0x1e2   :  { %v245_v43 = vadd.f32 %v507_v38, %v244_v42  ;;  %v591_v44 = vpop.f32.mrb[3].mxu1  ;;  %v248_v45 = vmax.f32 %v242_v40, 0.0 }
 0x1e4   :  { %v249_v46 = vmax.f32 %v245_v43, 0.0 }
 0x1e6   :  { %v250_v47 = vpack.c.bf16 %v249_v46, %v248_v45 }
 0x1e8   :  { %609 = vmatmul.mubr.bf16.vlgmr.msra.gmra.mrb[4].mxu0 %v250_v47 }
 0x2bb   :  { %v356_v51 = vpop.f32.mrb[4].mxu0 }
 0x2bc   :  { %v357_v52 = vadd.f32 %v516_v50, %v356_v51  ;;  %v610_v53 = vpop.f32.mrb[5].mxu0 }
 0x2bd   :  { %v359_v54 = vpop.f32.mrb[6].mxu0 }
 0x2be   :  { %v360_v55 = vadd.f32 %v516_v50, %v359_v54  ;;  %v611_v56 = vpop.f32.mrb[7].mxu0  ;;  %v363_v57 = vmax.f32 %v357_v52, 0.0 }
 0x2c0   :  { %v364_v58 = vmax.f32 %v360_v55, 0.0 }
 0x2c2   :  { %v365_v59 = vpack.c.bf16 %v364_v58, %v363_v57 }
 0x2c4   :  { %629 = vmatmul.mubr.bf16.vlgmr.msra.gmra.mrb[4].mxu1 %v365_v59 }
 0x397   :  { %v471_v61 = vpop.f32.mrb[4].mxu1 }
 0x398   :  { %v472_v62 = vadd.f32 %v525_v60, %v471_v61  ;;  %v630_v63 = vpop.f32.mrb[5].mxu1 }
 0x399   :  { %v474_v0 = vpop.f32.mrb[6].mxu1 }
 0x39a   :  { %667 = vtanh.f32 %v472_v62  ;;  %v475_v1 = vadd.f32 %v525_v60, %v474_v0  ;;  %v631_v2 = vpop.f32.mrb[7].mxu1 }
 0x39c   :  { %669 = vtanh.f32 %v475_v1 }
 0x3a4   :  { %v668_v3 = vpop.eup %667 }
 0x3a5   :  { %v480_v4 = vmul.f32 10.0, %v668_v3 }
 0x3a6   :  { %v670_v5 = vpop.eup %669 }
 0x3a7   :  { %483 = vst.msk [vmem:[#allocation7] sm:$0xff] %vm482_vm2, %v480_v4  ;;  %v481_v6 = vmul.f32 10.0, %v670_v5 }
 0x3a9   :  { %484 = vst.msk [vmem:[#allocation7 + $0x8] sm:$0xff] %vm482_vm2, %v481_v6 }
 0x3aa   :  { %489 = vsyncadd [#allocation4], 224  ;;  %s749_s6 = smov [#allocation7]  }
 0x3ab   :  { %s490_s7 = sshll.u32 %s749_s6, 4  ;;  %s491_s7 = int_to_ptr.vmem [resolvable:$true] %s490_s7 }
 0x3ac   :  { %s715_s8 = scalar_lea.vmem %s491_s7, 32  ;;  %s719_s28 = scalar_lea.vmem %s491_s7, 256 }
 0x3ad   :  { %p716_p2 = scmp.ne.s32.totalorder %s491_s7, %s715_s8  ;;  %p720_p3 = scmp.lt.s32.totalorder %s491_s7, %s491_s7 }
 0x3ae   :  { %p721_p4 = scmp.lt.s32.totalorder %s719_s28, %s715_s8 }
 0x3b0   :  { %p722_p5 = por %p721_p4, %p720_p3 }
 0x3b2   :  { %p723_p6 = pnand %p722_p5, %p716_p2 }
 0x3b4   :  { %726 = shalt.err (!%p723_p6)
}
 0x3b5   :  { %s727_s3 = scalar_lea.hbm %s947_s9, 32 }
 0x3b6   :  { %p728_p7 = scmp.ne.s32.totalorder %s947_s9, %s727_s3  ;;  %p731_p8 = scmp.lt.u32.totalorder %s727_s3, %s947_s9 }
 0x3b8   :  { %p733_p9 = pnand %p731_p8, %p728_p7 }
 0x3ba   :  { %736 = shalt.err (!%p733_p9)
}
 0x3bb   :  { %s750_s10 = smov 32   ;;  %s751_s5 = smov 2  }
 0x3bc   :  { %496 = dma.vmem_to_hbm [thread:$0]  %s491_s7, 32, %s947_s9, [#allocation4], %s750_s10, %s750_s10, %s751_s5  }
 0x3bd   :  { %741 = dma.done.wait [#allocation4], 256  }
 0x3be   :  { %742 = vsyncadd [#allocation4], 4294967040 }
 0x3bf   :  { %500 = vsyncpa [#allocation3], 1 }
 0x3c0   :  { %501 = vsyncpa [#allocation6], 1 }
 0x3c1   :  { %502 = vsyncpa [#allocation4], 1 }

</bundles_post_ra>
